<compile_context>
chip_gen: v6e
topology: v6e:2x2x1
jax: 0.10.0
libtpu: 0.0.40
codegen_flags: <defaults>
</compile_context>

<pallas_src>
import jax
import jax.numpy as jnp
from jax.experimental import pallas as pl
from jax.experimental.pallas import tpu as pltpu


def _round_up(x, m):
    return ((x + m - 1) // m) * m


def ncf_mlp_kernel(u_ref, v_ref, w1u_ref, w1i_ref, b1_ref, w2_ref, b2_ref, o_ref):
    """Fused NCF MLP tile: sigmoid(relu([u|v] @ W1 + b1) . w2 + b2).

    u_ref, v_ref   : (TB, E)  bf16 user / item embedding rows for this batch tile
    w1u_ref/w1i_ref: (E, H)   bf16 fc1 weight split (avoids materializing concat)
    b1_ref         : (1, H)   f32
    w2_ref         : (1, H)   f32 fc2 weight as a row
    b2_ref         : (1, 1)   f32
    o_ref          : (1, TB)  f32 -- batch on the lane axis (lane-dense stores)
    """
    # fc1 on the MXU with f32 accumulation.
    h = jnp.dot(u_ref[...], w1u_ref[...], preferred_element_type=jnp.float32)
    h += jnp.dot(v_ref[...], w1i_ref[...], preferred_element_type=jnp.float32)
    h = jnp.maximum(h + b1_ref[...], 0.0)
    # TODO(synk): nn.Dropout is identity in eval/inference mode, so it is omitted.
    # fc2: VPU multiply + XLU lane reduction instead of an (H,1) MXU matmul;
    # result written batch-on-lanes -> unmasked stores.
    logits = jnp.sum(h * w2_ref[...], axis=-1)[None, :] + b2_ref[...]   # (1, TB)
    o_ref[...] = jax.nn.sigmoid(logits)


def simplified_ncf_forward(user_indices, item_indices, params, *, tile_batch=512):
    """Forward pass matching SimplifiedNCF.forward (inference)."""
    user_emb = params["user_embedding"][user_indices]      # (B, E) bf16 gather (glue)
    item_emb = params["item_embedding"][item_indices]      # (B, E) bf16 gather (glue)
    # TODO(synk): the gather still round-trips HBM; a fully fused variant would
    # scalar-prefetch the index arrays and DMA-gather table rows in-kernel.

    B, E = user_emb.shape
    H = params["b1"].shape[-1]

    # Batch tile: multiple of 128 (lane-dense output) and >= 512 for realistic B.
    TB = min(tile_batch, _round_up(B, 128))
    B_pad = _round_up(B, TB)
    if B_pad != B:
        pad = ((0, B_pad - B), (0, 0))
        user_emb = jnp.pad(user_emb, pad)
        item_emb = jnp.pad(item_emb, pad)

    w1 = params["w1"]                                       # (2E, H) bf16
    w1u, w1i = w1[:E, :], w1[E:, :]                         # static split
    b1 = params["b1"].astype(jnp.float32)                   # (1, H)
    w2_row = params["w2"].reshape(1, H).astype(jnp.float32) # (1, H)
    b2 = params["b2"].astype(jnp.float32)                   # (1, 1)

    n_tiles = B_pad // TB
    cost = pl.CostEstimate(
        flops=2 * B_pad * (2 * E) * H + 4 * B_pad * H,
        transcendentals=B_pad,
        bytes_accessed=(2 * B_pad * E * user_emb.dtype.itemsize   # u, v streams
                        + 2 * E * H * w1.dtype.itemsize           # fc1 weights
                        + (2 * H + 1) * 4                         # b1, w2, b2
                        + B_pad * 4),                             # output
    )

    out = pl.pallas_call(
        ncf_mlp_kernel,
        out_shape=jax.ShapeDtypeStruct((1, B_pad), jnp.float32),
        grid=(n_tiles,),
        in_specs=[
            pl.BlockSpec((TB, E), lambda i: (i, 0)),      # user embeddings (tiled)
            pl.BlockSpec((TB, E), lambda i: (i, 0)),      # item embeddings (tiled)
            pl.BlockSpec((E, H), lambda i: (0, 0)),       # weights: constant index_map
            pl.BlockSpec((E, H), lambda i: (0, 0)),       #   -> fetched once, VMEM-resident
            pl.BlockSpec((1, H), lambda i: (0, 0)),
            pl.BlockSpec((1, H), lambda i: (0, 0)),
            pl.BlockSpec((1, 1), lambda i: (0, 0)),
        ],
        out_specs=pl.BlockSpec((1, TB), lambda i: (0, i)),  # lane-dense output
        compiler_params=pltpu.CompilerParams(
            dimension_semantics=("parallel",),              # shard tiles on v7x's 2 TCs
            vmem_limit_bytes=32 * 1024 * 1024,              # safe on v5e/v6e/v7x
        ),
        cost_estimate=cost,
    )(user_emb, item_emb, w1u, w1i, b1, w2_row, b2)

    # PyTorch's .squeeze(): (B, 1) -> (B,). (For B == 1 PyTorch returns a 0-d
    # tensor; here we keep shape (B,).)
    return out[0, :B]


def init_params(key, num_users, num_items, embedding_dim=32, hidden_dim=64):
    """Deterministic init mirroring SimplifiedNCF._init_weights."""
    k_ue, k_ie, k_w1, k_w2 = jax.random.split(key, 4)

    def xavier_uniform(k, fan_in, fan_out):
        limit = jnp.sqrt(6.0 / (fan_in + fan_out))
        # stored as (in, out) = transpose of PyTorch (out, in); distribution identical
        return jax.random.uniform(
            k, (fan_in, fan_out), jnp.float32, minval=-limit, maxval=limit
        )

    return {
        # Embedding tables and fc1 weight kept in bf16: the kernel is HBM-bound
        # on these streams; the MXU accumulates in f32.
        "user_embedding": (0.01 * jax.random.normal(
            k_ue, (num_users, embedding_dim), jnp.float32)).astype(jnp.bfloat16),
        "item_embedding": (0.01 * jax.random.normal(
            k_ie, (num_items, embedding_dim), jnp.float32)).astype(jnp.bfloat16),
        "w1": xavier_uniform(k_w1, 2 * embedding_dim, hidden_dim).astype(jnp.bfloat16),
        "b1": jnp.zeros((1, hidden_dim), jnp.float32),
        "w2": xavier_uniform(k_w2, hidden_dim, 1),
        "b2": jnp.zeros((1, 1), jnp.float32),
    }


def reference_forward(user_indices, item_indices, params):
    """Pure-JAX reference for correctness checking (f32 math on bf16 params)."""
    u = params["user_embedding"][user_indices].astype(jnp.float32)
    v = params["item_embedding"][item_indices].astype(jnp.float32)
    x = jnp.concatenate([u, v], axis=-1)
    w1 = params["w1"].astype(jnp.float32)
    h = jnp.maximum(x @ w1 + params["b1"], 0.0)
    return jax.nn.sigmoid(h @ params["w2"] + params["b2"]).squeeze()


if __name__ == "__main__":
    num_users, num_items = 100, 200
    embedding_dim, hidden_dim = 32, 64
    batch = 8

    key = jax.random.PRNGKey(0)
    k_params, k_u, k_i = jax.random.split(key, 3)

    params = init_params(k_params, num_users, num_items, embedding_dim, hidden_dim)
    user_indices = jax.random.randint(k_u, (batch,), 0, num_users)
    item_indices = jax.random.randint(k_i, (batch,), 0, num_items)

    fwd = jax.jit(simplified_ncf_forward)
    out = jax.block_until_ready(fwd(user_indices, item_indices, params))

    ref = reference_forward(user_indices, item_indices, params)
    assert out.shape == (batch,), out.shape
    assert jnp.allclose(out, ref, atol=1e-4, rtol=1e-4), (out, ref)

    print("KERNEL_OK")
</pallas_src>

<mosaic_0001>
module attributes {stable_mosaic.version = 11 : i64} {
  func.func @ncf_mlp_kernel(%arg0: i32, %arg1: memref<128x32xbf16, #tpu.memory_space<vmem>>, %arg2: memref<128x32xbf16, #tpu.memory_space<vmem>>, %arg3: memref<32x64xbf16, #tpu.memory_space<vmem>>, %arg4: memref<32x64xbf16, #tpu.memory_space<vmem>>, %arg5: memref<1x64xf32, #tpu.memory_space<vmem>>, %arg6: memref<1x64xf32, #tpu.memory_space<vmem>>, %arg7: memref<1x1xf32, #tpu.memory_space<vmem>>, %arg8: memref<1x128xf32, #tpu.memory_space<vmem>>) attributes {dimension_semantics = [#tpu.dimension_semantics<parallel>], iteration_bounds = array<i64: 1>, scalar_prefetch = 0 : i64, scratch_operands = 0 : i64, tpu.core_type = #tpu.core_type<tc>, window_params = [{transform_indices = @transform_0, window_bounds = array<i64: 128, 32>}, {transform_indices = @transform_1, window_bounds = array<i64: 128, 32>}, {pipeline_mode = #tpu.pipeline_mode<synchronous>, transform_indices = @transform_2, window_bounds = array<i64: 32, 64>}, {pipeline_mode = #tpu.pipeline_mode<synchronous>, transform_indices = @transform_3, window_bounds = array<i64: 32, 64>}, {pipeline_mode = #tpu.pipeline_mode<synchronous>, transform_indices = @transform_4, window_bounds = array<i64: 1, 64>}, {pipeline_mode = #tpu.pipeline_mode<synchronous>, transform_indices = @transform_5, window_bounds = array<i64: 1, 64>}, {pipeline_mode = #tpu.pipeline_mode<synchronous>, transform_indices = @transform_6, window_bounds = array<i64: 1, 1>}, {transform_indices = @transform_7, window_bounds = array<i64: 1, 128>}]} {
    %c0 = arith.constant 0 : index
    %c0_0 = arith.constant 0 : index
    %0 = vector.load %arg1[%c0, %c0_0] : memref<128x32xbf16, #tpu.memory_space<vmem>>, vector<128x32xbf16>
    %c0_1 = arith.constant 0 : index
    %c0_2 = arith.constant 0 : index
    %1 = vector.load %arg3[%c0_1, %c0_2] : memref<32x64xbf16, #tpu.memory_space<vmem>>, vector<32x64xbf16>
    %cst = arith.constant dense<0.000000e+00> : vector<128x64xf32>
    %2 = tpu.matmul %0, %1, %cst {dimension_numbers = #tpu.dot_dimension_numbers<[1], [0], [0], [1], [0, 0, 1, 1], [], []>} : vector<128x32xbf16>, vector<32x64xbf16>, vector<128x64xf32> -> vector<128x64xf32>
    %c0_3 = arith.constant 0 : index
    %c0_4 = arith.constant 0 : index
    %3 = vector.load %arg2[%c0_3, %c0_4] : memref<128x32xbf16, #tpu.memory_space<vmem>>, vector<128x32xbf16>
    %c0_5 = arith.constant 0 : index
    %c0_6 = arith.constant 0 : index
    %4 = vector.load %arg4[%c0_5, %c0_6] : memref<32x64xbf16, #tpu.memory_space<vmem>>, vector<32x64xbf16>
    %cst_7 = arith.constant dense<0.000000e+00> : vector<128x64xf32>
    %5 = tpu.matmul %3, %4, %cst_7 {dimension_numbers = #tpu.dot_dimension_numbers<[1], [0], [0], [1], [0, 0, 1, 1], [], []>} : vector<128x32xbf16>, vector<32x64xbf16>, vector<128x64xf32> -> vector<128x64xf32>
    %6 = arith.addf %2, %5 : vector<128x64xf32>
    %c0_8 = arith.constant 0 : index
    %c0_9 = arith.constant 0 : index
    %7 = vector.load %arg5[%c0_8, %c0_9] : memref<1x64xf32, #tpu.memory_space<vmem>>, vector<1x64xf32>
    %8 = vector.broadcast %7 : vector<1x64xf32> to vector<128x64xf32>
    %9 = arith.addf %6, %8 : vector<128x64xf32>
    %cst_10 = arith.constant 0.000000e+00 : f32
    %10 = vector.broadcast %cst_10 : f32 to vector<128x64xf32>
    %11 = arith.maximumf %9, %10 : vector<128x64xf32>
    %c0_11 = arith.constant 0 : index
    %c0_12 = arith.constant 0 : index
    %12 = vector.load %arg6[%c0_11, %c0_12] : memref<1x64xf32, #tpu.memory_space<vmem>>, vector<1x64xf32>
    %13 = vector.broadcast %12 : vector<1x64xf32> to vector<128x64xf32>
    %14 = arith.mulf %11, %13 : vector<128x64xf32>
    %cst_13 = arith.constant dense<0.000000e+00> : vector<128xf32>
    %15 = vector.multi_reduction <add>, %14, %cst_13 [1] : vector<128x64xf32> to vector<128xf32>
    %16 = vector.shape_cast %15 : vector<128xf32> to vector<1x128xf32>
    %c0_14 = arith.constant 0 : index
    %c0_15 = arith.constant 0 : index
    %17 = vector.load %arg7[%c0_14, %c0_15] : memref<1x1xf32, #tpu.memory_space<vmem>>, vector<1x1xf32>
    %18 = vector.broadcast %17 : vector<1x1xf32> to vector<1x128xf32>
    %19 = arith.addf %16, %18 : vector<1x128xf32>
    %20 = arith.negf %19 : vector<1x128xf32>
    %21 = math.exp %20 : vector<1x128xf32>
    %cst_16 = arith.constant 1.000000e+00 : f32
    %22 = vector.broadcast %cst_16 : f32 to vector<1x128xf32>
    %23 = arith.addf %22, %21 : vector<1x128xf32>
    %24 = arith.divf %22, %23 : vector<1x128xf32>
    %c0_17 = arith.constant 0 : index
    %c0_18 = arith.constant 0 : index
    %25 = vector.load %arg8[%c0_17, %c0_18] : memref<1x128xf32, #tpu.memory_space<vmem>>, vector<1x128xf32>
    tpu.vector_store %arg8[%c0_17, %c0_18], %24 {strides = array<i32>} : memref<1x128xf32, #tpu.memory_space<vmem>>, vector<1x128xf32>,
    return
  }
  func.func @transform_0(%arg0: i32) -> (i32, i32) {
    %c0_i32 = arith.constant 0 : i32
    %c0_i32_0 = arith.constant 0 : i32
    return %arg0, %c0_i32 : i32, i32
  }
  func.func @transform_1(%arg0: i32) -> (i32, i32) {
    %c0_i32 = arith.constant 0 : i32
    %c0_i32_0 = arith.constant 0 : i32
    return %arg0, %c0_i32 : i32, i32
  }
  func.func @transform_2(%arg0: i32) -> (i32, i32) {
    %c0_i32 = arith.constant 0 : i32
    %c0_i32_0 = arith.constant 0 : i32
    %c0_i32_1 = arith.constant 0 : i32
    return %c0_i32, %c0_i32_0 : i32, i32
  }
  func.func @transform_3(%arg0: i32) -> (i32, i32) {
    %c0_i32 = arith.constant 0 : i32
    %c0_i32_0 = arith.constant 0 : i32
    %c0_i32_1 = arith.constant 0 : i32
    return %c0_i32, %c0_i32_0 : i32, i32
  }
  func.func @transform_4(%arg0: i32) -> (i32, i32) {
    %c0_i32 = arith.constant 0 : i32
    %c0_i32_0 = arith.constant 0 : i32
    %c0_i32_1 = arith.constant 0 : i32
    return %c0_i32, %c0_i32_0 : i32, i32
  }
  func.func @transform_5(%arg0: i32) -> (i32, i32) {
    %c0_i32 = arith.constant 0 : i32
    %c0_i32_0 = arith.constant 0 : i32
    %c0_i32_1 = arith.constant 0 : i32
    return %c0_i32, %c0_i32_0 : i32, i32
  }
  func.func @transform_6(%arg0: i32) -> (i32, i32) {
    %c0_i32 = arith.constant 0 : i32
    %c0_i32_0 = arith.constant 0 : i32
    %c0_i32_1 = arith.constant 0 : i32
    return %c0_i32, %c0_i32_0 : i32, i32
  }
  func.func @transform_7(%arg0: i32) -> (i32, i32) {
    %c0_i32 = arith.constant 0 : i32
    %c0_i32_0 = arith.constant 0 : i32
    return %c0_i32, %arg0 : i32, i32
  }
}

</mosaic_0001>

<bundles_post_ra>
// kernel: simplified_ncf_forward.1
= control target key start
LH: loop header
LB: loop body
LE: loop exit
PB: predicated region body
PF: predicated region fallthrough
CT: control target
= control target key end

     0   :  { %vm121_vm0 = vcmask 261120   ;;  %v983_v21 = vmov 0   ;;  %vm478_vm1 = vcmask 523264   ;;  %vm676_vm2 = vcmask 130112   ;;  %s1219_s3 = inlined_call_operand.vmem [shape: bf16[32,64], index: 3, kind: input, shape index: {}]   ;;  %s1220_s2 = inlined_call_operand.vmem [shape: bf16[32,64], index: 2, kind: input, shape index: {}]   ;;  %s1221_s1 = inlined_call_operand.vmem [shape: bf16[128,32], index: 1, kind: input, shape index: {}]   ;;  %s1222_s0 = inlined_call_operand.vmem [shape: bf16[128,32], index: 0, kind: input, shape index: {}]   ;;  %s1223_s6 = inlined_call_operand.<no memory space> [shape: f32[1,1], index: 6, kind: input, shape index: {}]   ;;  %s1224_s4 = inlined_call_operand.vmem [shape: f32[1,64], index: 4, kind: input, shape index: {}]   ;;  %s1225_s5 = inlined_call_operand.vmem [shape: f32[1,64], index: 5, kind: input, shape index: {}]   ;;  %s1226_s7 = inlined_call_operand.vmem [shape: f32[1,128], index: 7, kind: output, shape index: {}]  }
   0x1   :  { %v899_v0 = vld [vmem:[%s1219_s3 + $0x8] sm:$0xff]   ;;  %v901_v2 = vld [vmem:[%s1219_s3] sm:$0xff]   ;;  %v907_v8 = vld [vmem:[%s1221_s1 + $0x10] sm:$0xff]   ;;  %v12_v20 = vstv %s1223_s6  ;;  %897 = vset.pattern.permute.xlu1 %v983_v21  ;;  %898 = vset.pattern.permute.xlu0 %v983_v21  ;;  %vm683_vm3 = vcmask 195712   ;;  %vm690_vm4 = vcmask 261312   ;;  %vm697_vm5 = vcmask 326912  }
   0x2   :  { %v900_v1 = vld [vmem:[%s1220_s2 + $0x8] sm:$0xff]   ;;  %856 = vmatprep.subr.bf16.mxu0 %v899_v0  ;;  %v902_v3 = vld [vmem:[%s1220_s2] sm:$0xff]   ;;  %v908_v9 = vld [vmem:[%s1222_s0 + $0x10] sm:$0xff]   ;;  %13 = vst [vmem:[#allocation2] sm:$0x1] %v12_v20  ;;  %vm704_vm6 = vcmask 392512  }
   0x3   :  { %876 = vmatprep.subr.bf16.mxu1 %v900_v1  ;;  %857 = vmatpush3.bf16.msra.mxu0 %v899_v0  ;;  %v903_v4 = vld [vmem:[%s1221_s1] sm:$0xff]   ;;  %v905_v6 = vld [vmem:[%s1221_s1 + $0x8] sm:$0xff]   ;;  %v909_v10 = vld [vmem:[%s1221_s1 + $0x18] sm:$0xff]   ;;  %vm711_vm7 = vcmask 458112   ;;  %vm718_vm8 = vcmask 523712   ;;  %vm725_vm9 = vcmask 589312  }
   0x4   :  { %877 = vmatpush3.bf16.msra.mxu1 %v900_v1  ;;  %858 = vmatprep.subr.bf16.mxu0 %v901_v2  ;;  %v904_v5 = vld [vmem:[%s1222_s0] sm:$0xff]   ;;  %v906_v7 = vld [vmem:[%s1222_s0 + $0x8] sm:$0xff]   ;;  %v910_v11 = vld [vmem:[%s1222_s0 + $0x18] sm:$0xff]   ;;  %vm732_vm10 = vcmask 654912   ;;  %vm739_vm11 = vcmask 720512   ;;  %vm746_vm12 = vcmask 786112  }
   0x5   :  { %878 = vmatprep.subr.bf16.mxu1 %v902_v3  ;;  %860 = vmatprep.mubr.msk.bf16.mxu0 %vm121_vm0, %v903_v4  ;;  %v911_v12 = vld [vmem:[%s1221_s1 + $0x20] sm:$0xff]   ;;  %v913_v14 = vld [vmem:[%s1221_s1 + $0x28] sm:$0xff]   ;;  %v915_v16 = vld [vmem:[%s1221_s1 + $0x30] sm:$0xff]   ;;  %vm753_vm13 = vcmask 851712   ;;  %vm760_vm14 = vcmask 917312   ;;  %vm767_vm15 = vcmask 982912  }
   0x6   :  { %880 = vmatprep.mubr.msk.bf16.mxu1 %vm121_vm0, %v904_v5  ;;  %v912_v13 = vld [vmem:[%s1222_s0 + $0x20] sm:$0xff]   ;;  %v914_v15 = vld [vmem:[%s1222_s0 + $0x28] sm:$0xff]   ;;  %v916_v17 = vld [vmem:[%s1222_s0 + $0x30] sm:$0xff]  }
   0x7   :  { %859 = vmatpush3.bf16.msra.mxu0 %v901_v2  ;;  %v917_v18 = vld [vmem:[%s1221_s1 + $0x38] sm:$0xff]   ;;  %v1106_v24 = vld [vmem:[%s1224_s4] ss:$0 sm:$0xff] }
   0x8   :  { %879 = vmatpush3.bf16.msra.mxu1 %v902_v3  ;;  %v918_v19 = vld [vmem:[%s1222_s0 + $0x38] sm:$0xff]   ;;  %v1112_v32 = vld [vmem:[%s1225_s5] ss:$0 sm:$0xff] }
   0xa   :  { %861 = vmatmul.mubr.msk.bf16.vlgmr.msra.gmra.mxu0 %vm121_vm0, %v905_v6 }
   0xb   :  { %881 = vmatmul.mubr.msk.bf16.vlgmr.msra.gmra.mxu1 %vm121_vm0, %v906_v7  ;;  %864 = vmatprep.mubr.msk.bf16.mxu0 %vm121_vm0, %v907_v8 }
   0xc   :  { %884 = vmatprep.mubr.msk.bf16.mxu1 %vm121_vm0, %v908_v9 }
  0x12   :  { %865 = vmatmul.mubr.msk.bf16.gmra.mxu0 %vm121_vm0, %v909_v10 }
  0x13   :  { %885 = vmatmul.mubr.msk.bf16.gmra.mxu1 %vm121_vm0, %v910_v11  ;;  %868 = vmatprep.mubr.msk.bf16.mxu0 %vm121_vm0, %v911_v12 }
  0x14   :  { %888 = vmatprep.mubr.msk.bf16.mxu1 %vm121_vm0, %v912_v13 }
  0x1a   :  { %869 = vmatmul.mubr.msk.bf16.gmra.mxu0 %vm121_vm0, %v913_v14 }
  0x1b   :  { %889 = vmatmul.mubr.msk.bf16.gmra.mxu1 %vm121_vm0, %v914_v15  ;;  %872 = vmatprep.mubr.msk.bf16.mxu0 %vm121_vm0, %v915_v16 }
  0x1c   :  { %892 = vmatprep.mubr.msk.bf16.mxu1 %vm121_vm0, %v916_v17 }
  0x22   :  { %873 = vmatmul.mubr.msk.bf16.gmra.mxu0 %vm121_vm0, %v917_v18 }
  0x23   :  { %893 = vmatmul.mubr.msk.bf16.gmra.mxu1 %vm121_vm0, %v918_v19  ;;  %vm774_vm0 = vcmask 1048512  }
  0xca   :  { %v862_v22 = vpop.f32.mrf.mxu0 }
  0xcb   :  { %v882_v23 = vpop.f32.mrf.mxu1 }
  0xcc   :  { %v362_v25 = vadd.f32 %v882_v23, %v862_v22  ;;  %v180_v26 = vpop.f32.mrf.mxu0 }
  0xcd   :  { %v353_v27 = vpop.f32.mrf.mxu1 }
  0xce   :  { %v425_v28 = vadd.f32 %v1106_v24, %v362_v25  ;;  %v354_v29 = vadd.f32 %v353_v27, %v180_v26  ;;  %v863_v30 = vpop.f32.mrf.mxu0 }
  0xcf   :  { %v883_v31 = vpop.f32.mrf.mxu1 }
  0xd0   :  { %v441_v33 = vmax.f32 %v425_v28, 0.0  ;;  %v423_v34 = vadd.f32 %v1106_v24, %v354_v29  ;;  %v365_v35 = vadd.f32 %v883_v31, %v863_v30  ;;  %v183_v36 = vpop.f32.mrf.mxu0 }
  0xd1   :  { %v356_v37 = vpop.f32.mrf.mxu1 }
  0xd2   :  { %v439_v38 = vmax.f32 %v423_v34, 0.0  ;;  %v426_v39 = vadd.f32 %v1106_v24, %v365_v35  ;;  %v357_v40 = vadd.f32 %v356_v37, %v183_v36  ;;  %v866_v41 = vpop.f32.mrf.mxu0  ;;  %v464_v42 = vmul.f32 %v1112_v32, %v441_v33 }
  0xd3   :  { %v886_v43 = vpop.f32.mrf.mxu1 }
  0xd4   :  { %v442_v44 = vmax.f32 %v426_v39, 0.0  ;;  %v424_v45 = vadd.f32 %v1106_v24, %v357_v40  ;;  %v378_v46 = vadd.f32 %v886_v43, %v866_v41  ;;  %v196_v47 = vpop.f32.mrf.mxu0  ;;  %v485_v48 = vsel %vm478_vm1, %v464_v42, 0.0 }
  0xd5   :  { %486 = vadd.xlane.f32.xlu1 %v485_v48  ;;  %v369_v49 = vpop.f32.mrf.mxu1  ;;  %v462_v50 = vmul.f32 %v1112_v32, %v439_v38 }
  0xd6   :  { %v440_v51 = vmax.f32 %v424_v45, 0.0  ;;  %v429_v52 = vadd.f32 %v1106_v24, %v378_v46  ;;  %v370_v53 = vadd.f32 %v369_v49, %v196_v47  ;;  %v867_v54 = vpop.f32.mrf.mxu0  ;;  %v465_v55 = vmul.f32 %v1112_v32, %v442_v44 }
  0xd7   :  { %v887_v56 = vpop.f32.mrf.mxu1  ;;  %v479_v57 = vsel %vm478_vm1, %v462_v50, 0.0 }
  0xd8   :  { %v445_v58 = vmax.f32 %v429_v52, 0.0  ;;  %v427_v59 = vadd.f32 %v1106_v24, %v370_v53  ;;  %v381_v60 = vadd.f32 %v887_v56, %v867_v54  ;;  %480 = vadd.xlane.f32.xlu0 %v479_v57  ;;  %v199_v61 = vpop.f32.mrf.mxu0  ;;  %v488_v62 = vsel %vm478_vm1, %v465_v55, 0.0 }
  0xd9   :  { %489 = vadd.xlane.f32.xlu1 %v488_v62  ;;  %v372_v63 = vpop.f32.mrf.mxu1  ;;  %v463_v0 = vmul.f32 %v1112_v32, %v440_v51  ;;  %v527_v62 = vld [vmem:[#allocation2] sm:$0x1] }
  0xda   :  { %v373_v1 = vadd.f32 %v372_v63, %v199_v61  ;;  %v870_v2 = vpop.f32.mrf.mxu0  ;;  %v443_v3 = vmax.f32 %v427_v59, 0.0  ;;  %v430_v4 = vadd.f32 %v1106_v24, %v381_v60  ;;  %v468_v6 = vmul.f32 %v1112_v32, %v445_v58 }
  0xdb   :  { %v482_v5 = vsel %vm478_vm1, %v463_v0, 0.0  ;;  %v890_v7 = vpop.f32.mrf.mxu1 }
  0xdc   :  { %v428_v8 = vadd.f32 %v1106_v24, %v373_v1  ;;  %483 = vadd.xlane.f32.xlu0 %v482_v5  ;;  %v394_v9 = vadd.f32 %v890_v7, %v870_v2  ;;  %v212_v10 = vpop.f32.mrf.mxu0  ;;  %v446_v16 = vmax.f32 %v430_v4, 0.0  ;;  %v497_v17 = vsel %vm478_vm1, %v468_v6, 0.0 }
  0xdd   :  { %v385_v11 = vpop.f32.mrf.mxu1  ;;  %v466_v18 = vmul.f32 %v1112_v32, %v443_v3 }
  0xde   :  { %v444_v12 = vmax.f32 %v428_v8, 0.0  ;;  %v433_v13 = vadd.f32 %v1106_v24, %v394_v9  ;;  %v386_v14 = vadd.f32 %v385_v11, %v212_v10  ;;  %v871_v15 = vpop.f32.mrf.mxu0  ;;  %v469_v33 = vmul.f32 %v1112_v32, %v446_v16 }
  0xdf   :  { %v891_v19 = vpop.f32.mrf.mxu1  ;;  %v491_v31 = vsel %vm478_vm1, %v466_v18, 0.0 }
  0xe0   :  { %498 = vadd.xlane.f32.xlu0 %v497_v17  ;;  %v449_v20 = vmax.f32 %v433_v13, 0.0  ;;  %v467_v21 = vmul.f32 %v1112_v32, %v444_v12  ;;  %v431_v22 = vadd.f32 %v1106_v24, %v386_v14  ;;  %v397_v23 = vadd.f32 %v891_v19, %v871_v15  ;;  %v215_v25 = vpop.f32.mrf.mxu0 }
  0xe1   :  { %v388_v26 = vpop.f32.mrf.mxu1  ;;  %v500_v43 = vsel %vm478_vm1, %v469_v33, 0.0  ;;  %v533_v15 = vlaneseq }
  0xe2   :  { %v494_v27 = vsel %vm478_vm1, %v467_v21, 0.0  ;;  %v434_v28 = vadd.f32 %v1106_v24, %v397_v23  ;;  %v389_v29 = vadd.f32 %v388_v26, %v215_v25  ;;  %v874_v30 = vpop.f32.mrf.mxu0  ;;  %v447_v35 = vmax.f32 %v431_v22, 0.0 }
  0xe3   :  { %495 = vadd.xlane.f32.xlu1 %v494_v27  ;;  %v894_v34 = vpop.f32.mrf.mxu1  ;;  %v472_v37 = vmul.f32 %v1112_v32, %v449_v20  ;;  %v1161_v18 = vshrl.u32 %v533_v15, 7 }
  0xe4   :  { %492 = vadd.xlane.f32.xlu0 %v491_v31  ;;  %v450_v36 = vmax.f32 %v434_v28, 0.0  ;;  %v228_v38 = vpop.f32.mrf.mxu0  ;;  %v432_v39 = vadd.f32 %v1106_v24, %v389_v29  ;;  %v410_v40 = vadd.f32 %v894_v34, %v874_v30  ;;  %v470_v47 = vmul.f32 %v1112_v32, %v447_v35 }
  0xe5   :  { %v401_v41 = vpop.f32.mrf.mxu1  ;;  %v509_v46 = vsel %vm478_vm1, %v472_v37, 0.0  ;;  %v535_v20 = vsub.s32 0, %v1161_v18 }
  0xe6   :  { %v875_v42 = vpop.f32.mrf.mxu0  ;;  %v473_v45 = vmul.f32 %v1112_v32, %v450_v36  ;;  %v448_v48 = vmax.f32 %v432_v39, 0.0  ;;  %v437_v49 = vadd.f32 %v1106_v24, %v410_v40  ;;  %v402_v50 = vadd.f32 %v401_v41, %v228_v38 }
  0xe7   :  { %v895_v44 = vpop.f32.mrf.mxu1  ;;  %v503_v54 = vsel %vm478_vm1, %v470_v47, 0.0 }
  0xe8   :  { %501 = vadd.xlane.f32.xlu0 %v500_v43  ;;  %v512_v51 = vsel %vm478_vm1, %v473_v45, 0.0  ;;  %v231_v52 = vpop.f32.mrf.mxu0  ;;  %v453_v55 = vmax.f32 %v437_v49, 0.0  ;;  %v435_v56 = vadd.f32 %v1106_v24, %v402_v50  ;;  %v471_v57 = vmul.f32 %v1112_v32, %v448_v48 }
  0xe9   :  { %v404_v53 = vpop.f32.mrf.mxu1  ;;  %v413_v59 = vadd.f32 %v895_v44, %v875_v42 }
  0xea   :  { %v405_v58 = vadd.f32 %v404_v53, %v231_v52  ;;  %v451_v60 = vmax.f32 %v435_v56, 0.0  ;;  %v506_v61 = vsel %vm478_vm1, %v471_v57, 0.0  ;;  %v476_v0 = vmul.f32 %v1112_v32, %v453_v55 }
  0xeb   :  { %v438_v1 = vadd.f32 %v1106_v24, %v413_v59 }
  0xec   :  { %510 = vadd.xlane.f32.xlu0 %v509_v46  ;;  %v436_v63 = vadd.f32 %v1106_v24, %v405_v58  ;;  %v521_v3 = vsel %vm478_vm1, %v476_v0, 0.0  ;;  %v474_v4 = vmul.f32 %v1112_v32, %v451_v60 }
  0xed   :  { %v454_v5 = vmax.f32 %v438_v1, 0.0  ;;  %v1180_v1 = vand.u32 127, %v533_v15 }
  0xee   :  { %v452_v2 = vmax.f32 %v436_v63, 0.0  ;;  %v515_v6 = vsel %vm478_vm1, %v474_v4, 0.0 }
  0xef   :  { %v477_v9 = vmul.f32 %v1112_v32, %v454_v5 }
  0xf0   :  { %504 = vadd.xlane.f32.xlu0 %v503_v54  ;;  %v475_v7 = vmul.f32 %v1112_v32, %v452_v2 }
  0xf1   :  { %v524_v10 = vsel %vm478_vm1, %v477_v9, 0.0 }
  0xf2   :  { %v518_v8 = vsel %vm478_vm1, %v475_v7, 0.0 }
  0xf4   :  { %507 = vadd.xlane.f32.xlu0 %v506_v61  ;;  %530 = vperm.xlu1 %897, %v527_v62  }
  0xf8   :  { %522 = vadd.xlane.f32.xlu0 %v521_v3 }
  0xfc   :  { %516 = vadd.xlane.f32.xlu0 %v515_v6 }
 0x100   :  { %519 = vadd.xlane.f32.xlu0 %v518_v8  ;;  %v671_v8 = vadd.s32 4294967288, %v1180_v1 }
 0x104   :  { %525 = vadd.xlane.f32.xlu0 %v524_v10 }
 0x118   :  { %513 = vadd.xlane.f32.xlu1 %v512_v51 }
 0x15e   :  { %v487_v11 = vpop.xlane.xlu1 %486 }
 0x161   :  { %v481_v24 = vpop.xlane.xlu0 %480 }
 0x162   :  { %v490_v14 = vpop.xlane.xlu1 %489 }
 0x165   :  { %v484_v12 = vpop.xlane.xlu0 %483 }
 0x169   :  { %v499_v13 = vpop.xlane.xlu0 %498 }
 0x16c   :  { %v496_v17 = vpop.xlane.xlu1 %495 }
 0x16d   :  { %v493_v16 = vpop.xlane.xlu0 %492 }
 0x170   :  { %v531_v21 = vpop.permute.xlu1 %530 }
 0x171   :  { %v502_v19 = vpop.xlane.xlu0 %501  ;;  %v1164_v22 = vrot.slane %v531_v21, %v535_v20 }
 0x173   :  { %v537_v23 = vadd.f32 %v1164_v22, %v481_v24  ;;  %v538_v26 = vadd.f32 %v1164_v22, %v484_v12  ;;  %v539_v27 = vadd.f32 %v1164_v22, %v487_v11  ;;  %v540_v31 = vadd.f32 %v1164_v22, %v490_v14 }
 0x174   :  { %v541_v34 = vadd.f32 %v1164_v22, %v493_v16  ;;  %v542_v37 = vadd.f32 %v1164_v22, %v496_v17  ;;  %v543_v39 = vadd.f32 %v1164_v22, %v499_v13  ;;  %v544_v42 = vadd.f32 %v1164_v22, %v502_v19 }
 0x175   :  { %v511_v32 = vpop.xlane.xlu0 %510  ;;  %v820_v28 = vmul.f32 -1.442695, %v537_v23  ;;  %v821_v29 = vmul.f32 -1.442695, %v538_v26  ;;  %v822_v33 = vmul.f32 -1.442695, %v539_v27  ;;  %v669_v16 = vsub.s32 %v1180_v1, %v1161_v18 }
 0x176   :  { %v823_v35 = vmul.f32 -1.442695, %v540_v31  ;;  %v824_v38 = vmul.f32 -1.442695, %v541_v34  ;;  %v825_v40 = vmul.f32 -1.442695, %v542_v37  ;;  %v547_v54 = vadd.f32 %v1164_v22, %v511_v32 }
 0x177   :  { %919 = vpow2.f32 %v820_v28  ;;  %v826_v45 = vmul.f32 -1.442695, %v543_v39  ;;  %v827_v47 = vmul.f32 -1.442695, %v544_v42  ;;  %v678_v14 = vadd.s32 4294967280, %v1180_v1 }
 0x178   :  { %921 = vpow2.f32 %v821_v29  ;;  %v830_v61 = vmul.f32 -1.442695, %v547_v54  ;;  %v674_v17 = vsub.s32 %v671_v8, %v1161_v18  ;;  %v685_v28 = vadd.s32 4294967272, %v1180_v1 }
 0x179   :  { %v505_v25 = vpop.xlane.xlu0 %504  ;;  %923 = vpow2.f32 %v822_v33 }
 0x17a   :  { %925 = vpow2.f32 %v823_v35  ;;  %v545_v46 = vadd.f32 %v1164_v22, %v505_v25  ;;  %v692_v35 = vadd.s32 4294967264, %v1180_v1 }
 0x17b   :  { %927 = vpow2.f32 %v824_v38  ;;  %v688_v38 = vsub.s32 %v685_v28, %v1161_v18 }
 0x17c   :  { %929 = vpow2.f32 %v825_v40  ;;  %v828_v53 = vmul.f32 -1.442695, %v545_v46 }
 0x17d   :  { %v508_v30 = vpop.xlane.xlu0 %507  ;;  %931 = vpow2.f32 %v826_v45 }
 0x17e   :  { %v546_v48 = vadd.f32 %v1164_v22, %v508_v30  ;;  %933 = vpow2.f32 %v827_v47 }
 0x180   :  { %v829_v55 = vmul.f32 -1.442695, %v546_v48  ;;  %v706_v48 = vadd.s32 4294967248, %v1180_v1 }
 0x181   :  { %v523_v36 = vpop.xlane.xlu0 %522 }
 0x182   :  { %v551_v62 = vadd.f32 %v1164_v22, %v523_v36 }
 0x184   :  { %v920_v43 = vpop.eup %919  ;;  %v834_v6 = vmul.f32 -1.442695, %v551_v62 }
 0x185   :  { %v517_v41 = vpop.xlane.xlu0 %516  ;;  %v922_v44 = vpop.eup %921  ;;  %v601_v49 = vadd.f32 1.0, %v920_v43 }
 0x186   :  { %v924_v51 = vpop.eup %923  ;;  %v602_v52 = vadd.f32 1.0, %v922_v44  ;;  %v549_v58 = vadd.f32 %v1164_v22, %v517_v41  ;;  %v699_v41 = vadd.s32 4294967256, %v1180_v1  ;;  %v695_v44 = vsub.s32 %v692_v35, %v1161_v18 }
 0x187   :  { %v603_v56 = vadd.f32 1.0, %v924_v51  ;;  %935 = vrcp.f32 %v601_v49  ;;  %v926_v57 = vpop.eup %925 }
 0x188   :  { %937 = vrcp.f32 %v602_v52  ;;  %v604_v63 = vadd.f32 1.0, %v926_v57  ;;  %v928_v0 = vpop.eup %927  ;;  %v832_v2 = vmul.f32 -1.442695, %v549_v58  ;;  %v702_v54 = vsub.s32 %v699_v41, %v1161_v18 }
 0x189   :  { %v520_v50 = vpop.xlane.xlu0 %519  ;;  %939 = vpow2.f32 %v828_v53  ;;  %v930_v5 = vpop.eup %929  ;;  %v605_v7 = vadd.f32 1.0, %v928_v0  ;;  %v713_v57 = vadd.s32 4294967240, %v1180_v1 }
 0x18a   :  { %v550_v59 = vadd.f32 %v1164_v22, %v520_v50  ;;  %941 = vpow2.f32 %v829_v55  ;;  %v606_v10 = vadd.f32 1.0, %v930_v5  ;;  %v932_v11 = vpop.eup %931 }
 0x18b   :  { %943 = vrcp.f32 %v603_v56  ;;  %v934_v13 = vpop.eup %933  ;;  %v607_v21 = vadd.f32 1.0, %v932_v11  ;;  %v716_v5 = vsub.s32 %v713_v57, %v1161_v18 }
 0x18c   :  { %v833_v4 = vmul.f32 -1.442695, %v550_v59  ;;  %945 = vpow2.f32 %v830_v61  ;;  %v608_v29 = vadd.f32 1.0, %v934_v13  ;;  %v709_v59 = vsub.s32 %v706_v48, %v1161_v18 }
 0x18d   :  { %v526_v60 = vpop.xlane.xlu0 %525  ;;  %947 = vrcp.f32 %v604_v63  ;;  %v720_v63 = vadd.s32 4294967232, %v1180_v1 }
 0x18e   :  { %v552_v3 = vadd.f32 %v1164_v22, %v526_v60  ;;  %949 = vpow2.f32 %v832_v2 }
 0x18f   :  { %951 = vpow2.f32 %v833_v4  ;;  %v723_v8 = vsub.s32 %v720_v63, %v1161_v18 }
 0x190   :  { %v835_v9 = vmul.f32 -1.442695, %v552_v3  ;;  %953 = vpow2.f32 %v834_v6  ;;  %v727_v3 = vadd.s32 4294967224, %v1180_v1 }
 0x191   :  { %955 = vrcp.f32 %v605_v7 }
 0x192   :  { %957 = vpow2.f32 %v835_v9 }
 0x193   :  { %959 = vrcp.f32 %v606_v10  ;;  %v730_v10 = vsub.s32 %v727_v3, %v1161_v18 }
 0x194   :  { %v936_v15 = vpop.eup %935 }
 0x195   :  { %v938_v20 = vpop.eup %937  ;;  %v670_v26 = vrot.slane %v936_v15, %v669_v16  ;;  %v748_v16 = vadd.s32 4294967200, %v1180_v1 }
 0x196   :  { %v940_v32 = vpop.eup %939  ;;  %v675_v27 = vrot.slane %v938_v20, %v674_v17  ;;  %v755_v20 = vadd.s32 4294967192, %v1180_v1 }
 0x197   :  { %v942_v23 = vpop.eup %941  ;;  %v609_v30 = vadd.f32 1.0, %v940_v32  ;;  %v762_v32 = vadd.s32 4294967184, %v1180_v1  ;;  %v751_v28 = vsub.s32 %v748_v16, %v1161_v18 }
 0x198   :  { %v944_v25 = vpop.eup %943  ;;  %v610_v31 = vadd.f32 1.0, %v942_v23  ;;  %v677_v37 = vsel %vm676_vm2, %v675_v27, %v670_v26 }
 0x199   :  { %v946_v33 = vpop.eup %945  ;;  %v765_v35 = vsub.s32 %v762_v32, %v1161_v18 }
 0x19a   :  { %v948_v36 = vpop.eup %947  ;;  %v611_v45 = vadd.f32 1.0, %v946_v33 }
 0x19b   :  { %v950_v39 = vpop.eup %949  ;;  %v689_v47 = vrot.slane %v948_v36, %v688_v38 }
 0x19c   :  { %v952_v40 = vpop.eup %951  ;;  %v613_v49 = vadd.f32 1.0, %v950_v39 }
 0x19d   :  { %v954_v42 = vpop.eup %953  ;;  %v614_v51 = vadd.f32 1.0, %v952_v40 }
 0x19e   :  { %v956_v46 = vpop.eup %955  ;;  %v615_v58 = vadd.f32 1.0, %v954_v42 }
 0x19f   :  { %v958_v50 = vpop.eup %957  ;;  %v696_v56 = vrot.slane %v956_v46, %v695_v44 }
 0x1a0   :  { %v960_v52 = vpop.eup %959  ;;  %v616_v60 = vadd.f32 1.0, %v958_v50 }
 0x1a1   :  { %v514_v24 = vpop.xlane.xlu1 %513  ;;  %v703_v2 = vrot.slane %v960_v52, %v702_v54 }
 0x1a2   :  { %v548_v12 = vadd.f32 %v1164_v22, %v514_v24  ;;  %v681_v22 = vsub.s32 %v678_v14, %v1161_v18  ;;  %v741_v14 = vadd.s32 4294967208, %v1180_v1 }
 0x1a4   :  { %v831_v19 = vmul.f32 -1.442695, %v548_v12  ;;  %v682_v34 = vrot.slane %v944_v25, %v681_v22  ;;  %v734_v12 = vadd.s32 4294967216, %v1180_v1  ;;  %v769_v22 = vadd.s32 4294967176, %v1180_v1 }
 0x1a5   :  { %v744_v25 = vsub.s32 %v741_v14, %v1161_v18 }
 0x1a6   :  { %961 = vpow2.f32 %v831_v19  ;;  %v684_v43 = vsel %vm683_vm3, %v682_v34, %v677_v37  ;;  %v772_v37 = vsub.s32 %v769_v22, %v1161_v18 }
 0x1a7   :  { %963 = vrcp.f32 %v607_v21  ;;  %v691_v53 = vsel %vm690_vm4, %v689_v47, %v684_v43  ;;  %v737_v21 = vsub.s32 %v734_v12, %v1161_v18 }
 0x1a8   :  { %965 = vrcp.f32 %v608_v29  ;;  %v698_v62 = vsel %vm697_vm5, %v696_v56, %v691_v53 }
 0x1a9   :  { %967 = vrcp.f32 %v609_v30  ;;  %v705_v4 = vsel %vm704_vm6, %v703_v2, %v698_v62 }
 0x1aa   :  { %969 = vrcp.f32 %v610_v31  ;;  %v758_v31 = vsub.s32 %v755_v20, %v1161_v18 }
 0x1ab   :  { %971 = vrcp.f32 %v611_v45 }
 0x1ac   :  { %973 = vrcp.f32 %v613_v49 }
 0x1ad   :  { %975 = vrcp.f32 %v614_v51 }
 0x1b3   :  { %v962_v55 = vpop.eup %961 }
 0x1b4   :  { %v612_v61 = vadd.f32 1.0, %v962_v55  ;;  %v964_v0 = vpop.eup %963 }
 0x1b5   :  { %v966_v6 = vpop.eup %965  ;;  %v710_v7 = vrot.slane %v964_v0, %v709_v59 }
 0x1b6   :  { %977 = vrcp.f32 %v612_v61  ;;  %v968_v9 = vpop.eup %967  ;;  %v717_v13 = vrot.slane %v966_v6, %v716_v5 }
 0x1b7   :  { %979 = vrcp.f32 %v615_v58  ;;  %v970_v24 = vpop.eup %969  ;;  %v712_v11 = vsel %vm711_vm7, %v710_v7, %v705_v4  ;;  %v724_v15 = vrot.slane %v968_v9, %v723_v8 }
 0x1b8   :  { %981 = vrcp.f32 %v616_v60  ;;  %v719_v17 = vsel %vm718_vm8, %v717_v13, %v712_v11  ;;  %v731_v19 = vrot.slane %v970_v24, %v730_v10  ;;  %v972_v23 = vpop.eup %971 }
 0x1b9   :  { %v974_v26 = vpop.eup %973  ;;  %v726_v27 = vsel %vm725_vm9, %v724_v15, %v719_v17  ;;  %v738_v34 = vrot.slane %v972_v23, %v737_v21 }
 0x1ba   :  { %v976_v29 = vpop.eup %975  ;;  %v733_v30 = vsel %vm732_vm10, %v731_v19, %v726_v27  ;;  %v752_v39 = vrot.slane %v974_v26, %v751_v28 }
 0x1bb   :  { %v740_v40 = vsel %vm739_vm11, %v738_v34, %v733_v30  ;;  %v759_v41 = vrot.slane %v976_v29, %v758_v31 }
 0x1c3   :  { %v978_v33 = vpop.eup %977 }
 0x1c4   :  { %v980_v36 = vpop.eup %979  ;;  %v745_v1 = vrot.slane %v978_v33, %v744_v25 }
 0x1c5   :  { %v982_v38 = vpop.eup %981  ;;  %v766_v43 = vrot.slane %v980_v36, %v765_v35 }
 0x1c6   :  { %v747_v42 = vsel %vm746_vm12, %v745_v1, %v740_v40  ;;  %v773_v45 = vrot.slane %v982_v38, %v772_v37 }
 0x1c7   :  { %v754_v44 = vsel %vm753_vm13, %v752_v39, %v747_v42 }
 0x1c8   :  { %v761_v46 = vsel %vm760_vm14, %v759_v41, %v754_v44 }
 0x1c9   :  { %v768_v47 = vsel %vm767_vm15, %v766_v43, %v761_v46 }
 0x1ca   :  { %v775_v48 = vsel %vm774_vm0, %v773_v45, %v768_v47 }
 0x1cb   :  { %777 = vst [vmem:[%s1226_s7] sm:$0x1] %v775_v48 }

</bundles_post_ra>
